<compile_context>
chip_gen: v6e
topology: v6e:2x2x1
jax: 0.10.0
libtpu: 0.0.40
codegen_flags: <defaults>
</compile_context>

<pallas_src>
import jax
import jax.numpy as jnp
from jax.experimental import pallas as pl
from jax.experimental.pallas import tpu as pltpu

H1, H2, H3 = 256, 128, 64


def _mlp_kernel(x_ref,
                w1_ref, b1_ref,
                w2_ref, b2_ref,
                w3_ref, b3_ref,
                o_ref):
    # Layer 1: Linear (eval-mode BN folded into w1/b1) -> ReLU. x already bf16.
    h1 = jnp.dot(x_ref[...], w1_ref[...], preferred_element_type=jnp.float32)
    h1 = jnp.maximum(h1 + b1_ref[...], 0.0)

    # Layer 2: Linear (BN folded) -> ReLU
    h2 = jnp.dot(h1.astype(jnp.bfloat16), w2_ref[...],
                 preferred_element_type=jnp.float32)
    h2 = jnp.maximum(h2 + b2_ref[...], 0.0)

    # Layer 3: Linear -> ReLU (dropout is identity in eval mode).
    h3 = jnp.dot(h2.astype(jnp.bfloat16), w3_ref[...],
                 preferred_element_type=jnp.float32)
    o_ref[...] = jnp.maximum(h3 + b3_ref[...], 0.0)


def _round_up(v, m):
    return ((v + m - 1) // m) * m


def prepare_params(params, *, eps=1e-5):
    """One-time prep: fold eval-mode BatchNorm into the preceding linear and
    cast weights to bf16 (MXU inputs).  Biases stay f32 (VPU add + ReLU)."""
    # bn(z) = gamma*(z - mean)/sqrt(var+eps) + beta = z*s + t
    #   => w' = w * s (per output column), b' = b*s + t
    def fold(w, b, gamma, beta, mean, var):
        s = gamma / jnp.sqrt(var + eps)
        t = beta - mean * s
        return w * s[None, :], b * s + t

    w1f, b1f = fold(params["w1"], params["b1"],
                    params["bn1_gamma"], params["bn1_beta"],
                    params["bn1_mean"], params["bn1_var"])
    w2f, b2f = fold(params["w2"], params["b2"],
                    params["bn2_gamma"], params["bn2_beta"],
                    params["bn2_mean"], params["bn2_var"])

    return {
        "w1": w1f.astype(jnp.bfloat16),
        "b1": b1f.reshape(1, H1).astype(jnp.float32),
        "w2": w2f.astype(jnp.bfloat16),
        "b2": b2f.reshape(1, H2).astype(jnp.float32),
        "w3": params["w3"].astype(jnp.bfloat16),
        "b3": params["b3"].reshape(1, H3).astype(jnp.float32),
    }


def advanced_tabular_forward(x, prepared, *, tm=1024):
    """x: (B, D) float32.  prepared: output of prepare_params()."""
    B, D = x.shape
    w1, b1 = prepared["w1"], prepared["b1"]
    w2, b2 = prepared["w2"], prepared["b2"]
    w3, b3 = prepared["w3"], prepared["b3"]
    assert w1.shape == (D, H1), (w1.shape, D)

    # ---- Batch tiling: TM multiple of 16 (bf16 sublane packing) ------------
    TM = max(16, min(_round_up(tm, 16), _round_up(B, 16)))
    n = -(-B // TM)
    if n > 1 and n % 2 == 1:
        # Prefer an even number of grid steps so v7x's two TensorCores get
        # balanced shards of the "parallel" batch axis (no-op on v5e/v6e).
        n += 1
        TM = max(16, _round_up(-(-B // n), 16))
        n = -(-B // TM)
    Bp = n * TM

    # ---- Single pass over x: bf16 cast (+ batch pad if needed) -------------
    # Native contraction dim D (no pad to 128) — Mosaic handles the short K,
    # and the kernel streams ~4x fewer x bytes from HBM.
    xb = x.astype(jnp.bfloat16)
    if Bp != B:
        xb = jnp.pad(xb, ((0, Bp - B), (0, 0)))

    const = lambda shape: pl.BlockSpec(shape, lambda i: (0, 0))

    flops = 2 * Bp * (D * H1 + H1 * H2 + H2 * H3)
    bytes_accessed = (Bp * D * 2                       # x (bf16)
                      + Bp * H3 * 4                    # out (f32)
                      + 2 * (D * H1 + H1 * H2 + H2 * H3)   # bf16 weights
                      + 4 * (H1 + H2 + H3))            # f32 biases

    out = pl.pallas_call(
        _mlp_kernel,
        out_shape=jax.ShapeDtypeStruct((Bp, H3), jnp.float32),
        grid=(n,),
        in_specs=[
            pl.BlockSpec((TM, D), lambda i: (i, 0)),    # x tile (streamed)
            const((D, H1)), const((1, H1)),             # w1', b1' (resident)
            const((H1, H2)), const((1, H2)),            # w2', b2'
            const((H2, H3)), const((1, H3)),            # w3,  b3
        ],
        out_specs=pl.BlockSpec((TM, H3), lambda i: (i, 0)),
        compiler_params=pltpu.CompilerParams(
            dimension_semantics=("parallel",)),
        cost_estimate=pl.CostEstimate(flops=flops, transcendentals=0,
                                      bytes_accessed=bytes_accessed),
    )(xb, w1, b1, w2, b2, w3, b3)

    # Slice away batch padding only when it exists (no column slice needed).
    return out if Bp == B else out[:B]


def init_params(key, input_dim):
    """Deterministic init matching the PyTorch module's parameter shapes."""
    k = jax.random.split(key, 6)

    def linear(kw, kb, fan_in, fan_out):
        bound = 1.0 / jnp.sqrt(fan_in)
        w = jax.random.uniform(kw, (fan_in, fan_out), jnp.float32, -bound, bound)
        b = jax.random.uniform(kb, (fan_out,), jnp.float32, -bound, bound)
        return w, b

    w1, b1 = linear(k[0], k[1], input_dim, H1)
    w2, b2 = linear(k[2], k[3], H1, H2)
    w3, b3 = linear(k[4], k[5], H2, H3)

    return {
        "w1": w1, "b1": b1,
        "w2": w2, "b2": b2,
        "w3": w3, "b3": b3,
        # BatchNorm1d defaults: gamma=1, beta=0, running_mean=0, running_var=1
        "bn1_gamma": jnp.ones((H1,), jnp.float32),
        "bn1_beta": jnp.zeros((H1,), jnp.float32),
        "bn1_mean": jnp.zeros((H1,), jnp.float32),
        "bn1_var": jnp.ones((H1,), jnp.float32),
        "bn2_gamma": jnp.ones((H2,), jnp.float32),
        "bn2_beta": jnp.zeros((H2,), jnp.float32),
        "bn2_mean": jnp.zeros((H2,), jnp.float32),
        "bn2_var": jnp.ones((H2,), jnp.float32),
    }


if __name__ == "__main__":
    key = jax.random.PRNGKey(0)
    k_x, k_p = jax.random.split(key)

    batch, input_dim = 8, 32
    x = jax.random.normal(k_x, (batch, input_dim), jnp.float32)
    params = init_params(k_p, input_dim)

    # One-time parameter prep (BN fold + bf16 cast), reused across calls.
    prepared = prepare_params(params)

    out = advanced_tabular_forward(x, prepared)
    jax.block_until_ready(out)

    assert out.shape == (batch, 64), out.shape
    assert out.dtype == jnp.float32, out.dtype
    assert bool(jnp.all(jnp.isfinite(out)))
    assert bool(jnp.all(out >= 0.0))  # ReLU output
    print("KERNEL_OK")
</pallas_src>

<mosaic_0001>
module attributes {stable_mosaic.version = 11 : i64} {
  func.func @_mlp_kernel(%arg0: i32, %arg1: memref<16x32xbf16, #tpu.memory_space<vmem>>, %arg2: memref<32x256xbf16, #tpu.memory_space<vmem>>, %arg3: memref<1x256xf32, #tpu.memory_space<vmem>>, %arg4: memref<256x128xbf16, #tpu.memory_space<vmem>>, %arg5: memref<1x128xf32, #tpu.memory_space<vmem>>, %arg6: memref<128x64xbf16, #tpu.memory_space<vmem>>, %arg7: memref<1x64xf32, #tpu.memory_space<vmem>>, %arg8: memref<16x64xf32, #tpu.memory_space<vmem>>) attributes {dimension_semantics = [#tpu.dimension_semantics<parallel>], iteration_bounds = array<i64: 1>, scalar_prefetch = 0 : i64, scratch_operands = 0 : i64, tpu.core_type = #tpu.core_type<tc>, window_params = [{transform_indices = @transform_0, window_bounds = array<i64: 16, 32>}, {pipeline_mode = #tpu.pipeline_mode<synchronous>, transform_indices = @transform_1, window_bounds = array<i64: 32, 256>}, {pipeline_mode = #tpu.pipeline_mode<synchronous>, transform_indices = @transform_2, window_bounds = array<i64: 1, 256>}, {pipeline_mode = #tpu.pipeline_mode<synchronous>, transform_indices = @transform_3, window_bounds = array<i64: 256, 128>}, {pipeline_mode = #tpu.pipeline_mode<synchronous>, transform_indices = @transform_4, window_bounds = array<i64: 1, 128>}, {pipeline_mode = #tpu.pipeline_mode<synchronous>, transform_indices = @transform_5, window_bounds = array<i64: 128, 64>}, {pipeline_mode = #tpu.pipeline_mode<synchronous>, transform_indices = @transform_6, window_bounds = array<i64: 1, 64>}, {transform_indices = @transform_7, window_bounds = array<i64: 16, 64>}]} {
    %c0 = arith.constant 0 : index
    %c0_0 = arith.constant 0 : index
    %0 = vector.load %arg1[%c0, %c0_0] : memref<16x32xbf16, #tpu.memory_space<vmem>>, vector<16x32xbf16>
    %c0_1 = arith.constant 0 : index
    %c0_2 = arith.constant 0 : index
    %1 = vector.load %arg2[%c0_1, %c0_2] : memref<32x256xbf16, #tpu.memory_space<vmem>>, vector<32x256xbf16>
    %cst = arith.constant dense<0.000000e+00> : vector<16x256xf32>
    %2 = tpu.matmul %0, %1, %cst {dimension_numbers = #tpu.dot_dimension_numbers<[1], [0], [0], [1], [0, 0, 1, 1], [], []>} : vector<16x32xbf16>, vector<32x256xbf16>, vector<16x256xf32> -> vector<16x256xf32>
    %c0_3 = arith.constant 0 : index
    %c0_4 = arith.constant 0 : index
    %3 = vector.load %arg3[%c0_3, %c0_4] : memref<1x256xf32, #tpu.memory_space<vmem>>, vector<1x256xf32>
    %4 = vector.broadcast %3 : vector<1x256xf32> to vector<16x256xf32>
    %5 = arith.addf %2, %4 : vector<16x256xf32>
    %cst_5 = arith.constant 0.000000e+00 : f32
    %6 = vector.broadcast %cst_5 : f32 to vector<16x256xf32>
    %7 = arith.maximumf %5, %6 : vector<16x256xf32>
    %8 = arith.truncf %7 : vector<16x256xf32> to vector<16x256xbf16>
    %c0_6 = arith.constant 0 : index
    %c0_7 = arith.constant 0 : index
    %9 = vector.load %arg4[%c0_6, %c0_7] : memref<256x128xbf16, #tpu.memory_space<vmem>>, vector<256x128xbf16>
    %cst_8 = arith.constant dense<0.000000e+00> : vector<16x128xf32>
    %10 = tpu.matmul %8, %9, %cst_8 {dimension_numbers = #tpu.dot_dimension_numbers<[1], [0], [0], [1], [0, 0, 1, 1], [], []>} : vector<16x256xbf16>, vector<256x128xbf16>, vector<16x128xf32> -> vector<16x128xf32>
    %c0_9 = arith.constant 0 : index
    %c0_10 = arith.constant 0 : index
    %11 = vector.load %arg5[%c0_9, %c0_10] : memref<1x128xf32, #tpu.memory_space<vmem>>, vector<1x128xf32>
    %12 = vector.broadcast %11 : vector<1x128xf32> to vector<16x128xf32>
    %13 = arith.addf %10, %12 : vector<16x128xf32>
    %cst_11 = arith.constant 0.000000e+00 : f32
    %14 = vector.broadcast %cst_11 : f32 to vector<16x128xf32>
    %15 = arith.maximumf %13, %14 : vector<16x128xf32>
    %16 = arith.truncf %15 : vector<16x128xf32> to vector<16x128xbf16>
    %c0_12 = arith.constant 0 : index
    %c0_13 = arith.constant 0 : index
    %17 = vector.load %arg6[%c0_12, %c0_13] : memref<128x64xbf16, #tpu.memory_space<vmem>>, vector<128x64xbf16>
    %cst_14 = arith.constant dense<0.000000e+00> : vector<16x64xf32>
    %18 = tpu.matmul %16, %17, %cst_14 {dimension_numbers = #tpu.dot_dimension_numbers<[1], [0], [0], [1], [0, 0, 1, 1], [], []>} : vector<16x128xbf16>, vector<128x64xbf16>, vector<16x64xf32> -> vector<16x64xf32>
    %c0_15 = arith.constant 0 : index
    %c0_16 = arith.constant 0 : index
    %19 = vector.load %arg7[%c0_15, %c0_16] : memref<1x64xf32, #tpu.memory_space<vmem>>, vector<1x64xf32>
    %20 = vector.broadcast %19 : vector<1x64xf32> to vector<16x64xf32>
    %21 = arith.addf %18, %20 : vector<16x64xf32>
    %cst_17 = arith.constant 0.000000e+00 : f32
    %22 = vector.broadcast %cst_17 : f32 to vector<16x64xf32>
    %23 = arith.maximumf %21, %22 : vector<16x64xf32>
    %c0_18 = arith.constant 0 : index
    %c0_19 = arith.constant 0 : index
    %24 = vector.load %arg8[%c0_18, %c0_19] : memref<16x64xf32, #tpu.memory_space<vmem>>, vector<16x64xf32>
    tpu.vector_store %arg8[%c0_18, %c0_19], %23 {strides = array<i32>} : memref<16x64xf32, #tpu.memory_space<vmem>>, vector<16x64xf32>,
    return
  }
  func.func @transform_0(%arg0: i32) -> (i32, i32) {
    %c0_i32 = arith.constant 0 : i32
    %c0_i32_0 = arith.constant 0 : i32
    return %arg0, %c0_i32 : i32, i32
  }
  func.func @transform_1(%arg0: i32) -> (i32, i32) {
    %c0_i32 = arith.constant 0 : i32
    %c0_i32_0 = arith.constant 0 : i32
    %c0_i32_1 = arith.constant 0 : i32
    return %c0_i32, %c0_i32_0 : i32, i32
  }
  func.func @transform_2(%arg0: i32) -> (i32, i32) {
    %c0_i32 = arith.constant 0 : i32
    %c0_i32_0 = arith.constant 0 : i32
    %c0_i32_1 = arith.constant 0 : i32
    return %c0_i32, %c0_i32_0 : i32, i32
  }
  func.func @transform_3(%arg0: i32) -> (i32, i32) {
    %c0_i32 = arith.constant 0 : i32
    %c0_i32_0 = arith.constant 0 : i32
    %c0_i32_1 = arith.constant 0 : i32
    return %c0_i32, %c0_i32_0 : i32, i32
  }
  func.func @transform_4(%arg0: i32) -> (i32, i32) {
    %c0_i32 = arith.constant 0 : i32
    %c0_i32_0 = arith.constant 0 : i32
    %c0_i32_1 = arith.constant 0 : i32
    return %c0_i32, %c0_i32_0 : i32, i32
  }
  func.func @transform_5(%arg0: i32) -> (i32, i32) {
    %c0_i32 = arith.constant 0 : i32
    %c0_i32_0 = arith.constant 0 : i32
    %c0_i32_1 = arith.constant 0 : i32
    return %c0_i32, %c0_i32_0 : i32, i32
  }
  func.func @transform_6(%arg0: i32) -> (i32, i32) {
    %c0_i32 = arith.constant 0 : i32
    %c0_i32_0 = arith.constant 0 : i32
    %c0_i32_1 = arith.constant 0 : i32
    return %c0_i32, %c0_i32_0 : i32, i32
  }
  func.func @transform_7(%arg0: i32) -> (i32, i32) {
    %c0_i32 = arith.constant 0 : i32
    %c0_i32_0 = arith.constant 0 : i32
    return %arg0, %c0_i32 : i32, i32
  }
}

</mosaic_0001>

<bundles_post_ra>
// kernel: tpu_custom_call.1
= control target key start
LH: loop header
LB: loop body
LE: loop exit
PB: predicated region body
PF: predicated region fallthrough
CT: control target
= control target key end

     0   :  { %12 = vsyncpa [#allocation3], 0  ;;  %s721_s0 = inlined_call_operand.vmem [shape: bf16[16,32], index: 0, kind: input, shape index: {}]   ;;  %s722_s1 = inlined_call_operand.vmem [shape: bf16[32,256], index: 1, kind: input, shape index: {}]   ;;  %s723_s2 = inlined_call_operand.vmem [shape: f32[1,256], index: 2, kind: input, shape index: {}]   ;;  %s724_s3 = inlined_call_operand.hbm [shape: bf16[256,128], index: 3, kind: input, shape index: {}]   ;;  %s725_s4 = inlined_call_operand.vmem [shape: f32[1,128], index: 4, kind: input, shape index: {}]   ;;  %s726_s5 = inlined_call_operand.vmem [shape: bf16[128,64], index: 5, kind: input, shape index: {}]   ;;  %s727_s6 = inlined_call_operand.vmem [shape: f32[1,64], index: 6, kind: input, shape index: {}]   ;;  %s728_s7 = inlined_call_operand.hbm [shape: f32[16,64], index: 7, kind: output, shape index: {}]  }
   0x1   :  { %13 = vsyncpa [#allocation4], 0  ;;  %s618_s24 = smov [#allocation2]  }
   0x2   :  { %s25_s25 = sshll.u32 %s618_s24, 4  ;;  %s26_s25 = int_to_ptr.vmem [resolvable:$true] %s25_s25 }
   0x3   :  { %s582_s26 = scalar_lea.vmem %s26_s25, 2048  ;;  %p587_p1 = scmp.lt.s32.totalorder %s26_s25, %s26_s25 }
   0x4   :  { %p583_p0 = scmp.ne.s32.totalorder %s26_s25, %s582_s26  ;;  %p588_p2 = scmp.lt.s32.totalorder %s582_s26, %s582_s26 }
   0x6   :  { %p589_p3 = por %p588_p2, %p587_p1 }
   0x8   :  { %p590_p4 = pnand %p589_p3, %p583_p0 }
   0xa   :  { %593 = shalt.err (!%p590_p4)
}
   0xb   :  { %s619_s27 = smov 64   ;;  %s620_s28 = smov 4  }
   0xc   :  { %31 = dma.hbm_to_vmem [thread:$0]  %s724_s3, 2048, %s26_s25, [#allocation3], %s619_s27, %s619_s27, %s620_s28  }
   0xd   :  { %614 = dma.done.wait [#allocation3], 2048  }
   0xe   :  { %615 = vsyncadd [#allocation3], 4294965248  ;;  %v621_v0 = vmov 0   ;;  %v543_v1 = vld [vmem:[%s722_s1 + $0x14] ss:$8 sps:$4 sm:$0xff]   ;;  %v549_v5 = vld [vmem:[%s721_s0] sm:$0xff]   ;;  %v50_v27 = vlaneseq }
   0xf   :  { %121 = vmatprep.mubr.bf16.mxu0 %v621_v0  ;;  %v545_v2 = vld [vmem:[%s722_s1 + $0x10] ss:$8 sps:$4 sm:$0xff]   ;;  %101 = vmatprep.subr.bf16.mxu0 %v543_v1  ;;  %v546_v3 = vld [vmem:[%s722_s1 + $0x4] ss:$8 sps:$4 sm:$0xff]   ;;  %v548_v4 = vld [vmem:[%s722_s1] ss:$8 sps:$4 sm:$0xff]  }
  0x10   :  { %102 = vmatpush1.bf16.msra.mxu0 %v545_v2  ;;  %v550_v6 = vld [vmem:[#allocation2 + $0x78] sm:$0xff]   ;;  %v552_v8 = vld [vmem:[#allocation2 + $0x70] sm:$0xff]   ;;  %vm85_vm0 = vcmask 261120   ;;  %v554_v10 = vld [vmem:[#allocation2 + $0x68] sm:$0xff]   ;;  %v622_v23 = vmov 0.0   ;;  %v51_v28 = vshrl.u32 %v50_v27, 7 }
  0x11   :  { %103 = vmatprep.subr.bf16.mxu0 %v546_v3  ;;  %v551_v7 = vld [vmem:[#allocation2 + $0x38] sm:$0xff]   ;;  %483 = vmatprep.subr.bf16.mxu1 %v550_v6  ;;  %v553_v9 = vld [vmem:[#allocation2 + $0x30] sm:$0xff]   ;;  %v555_v11 = vld [vmem:[#allocation2 + $0x28] sm:$0xff]   ;;  %vm623_vm1 = vmmov 0   ;;  %vm431_vm2 = vcmask 523264   ;;  %s624_s12 = smov [#allocation5]  }
  0x12   :  { %484 = vmatpush3.bf16.msra.mxu1 %v551_v7  ;;  %v556_v12 = vld [vmem:[#allocation2 + $0x60] sm:$0xff]   ;;  %v558_v14 = vld [vmem:[#allocation2 + $0x58] sm:$0xff]   ;;  %v560_v16 = vld [vmem:[#allocation2 + $0x50] sm:$0xff]   ;;  %v56_v29 = vsub.s32 1, %v51_v28  ;;  %v52_v30 = vsub.s32 0, %v51_v28 }
  0x13   :  { %485 = vmatprep.subr.bf16.mxu1 %v552_v8  ;;  %v557_v13 = vld [vmem:[#allocation2 + $0x20] sm:$0xff]   ;;  %v559_v15 = vld [vmem:[#allocation2 + $0x18] sm:$0xff]   ;;  %v561_v17 = vld [vmem:[#allocation2 + $0x10] sm:$0xff]  }
  0x14   :  { %104 = vmatpush1.bf16.msra.mxu0 %v548_v4  ;;  %v562_v18 = vld [vmem:[#allocation2 + $0x48] sm:$0xff]   ;;  %v564_v20 = vld [vmem:[#allocation2 + $0x40] sm:$0xff]   ;;  %v566_v22 = vld [vmem:[%s726_s5 + $0x38] sm:$0xff]  }
  0x15   :  { %v563_v19 = vld [vmem:[#allocation2 + $0x8] sm:$0xff]   ;;  %v565_v21 = vld [vmem:[#allocation2] sm:$0xff]   ;;  %514 = vmatprep.subr.bf16.mxu0 %v622_v23  ;;  %v567_v24 = vld [vmem:[%s726_s5 + $0x30] sm:$0xff]  }
  0x16   :  { %486 = vmatpush3.bf16.msra.mxu1 %v553_v9  ;;  %v568_v25 = vld [vmem:[%s726_s5 + $0x28] sm:$0xff]   ;;  %v569_v26 = vld [vmem:[%s726_s5 + $0x20] sm:$0xff]   ;;  %v570_v48 = vld [vmem:[%s726_s5 + $0x18] sm:$0xff]  }
  0x17   :  { %456 = vmatmul.mubr.msk.bf16.vlgmr.msra.gmra.mxu0 %vm85_vm0, %v549_v5  ;;  %487 = vmatprep.subr.bf16.mxu1 %v554_v10  ;;  %v48_v31 = vld [vmem:[%s723_s2] sm:$0x3]  ;;  %v571_v49 = vld [vmem:[%s726_s5 + $0x10] sm:$0xff]   ;;  %v572_v50 = vld [vmem:[%s726_s5 + $0x8] sm:$0xff]  }
  0x18   :  { %515 = vmatpush3.bf16.msra.mxu0 %v566_v22  ;;  %v57_v33 = vrot.slane %v48_v31, %v56_v29  ;;  %v53_v34 = vrot.slane %v48_v31, %v52_v30  ;;  %v573_v51 = vld [vmem:[%s726_s5] sm:$0xff]   ;;  %530 = vmatprep.mubr.msk.bf16.mxu0 %vm623_vm1, %v622_v23 }
  0x19   :  { %516 = vmatprep.subr.bf16.mxu0 %v622_v23  ;;  %v457_v55 = vld [vmem:[%s725_s4] ss:$0 sm:$0xff]  ;;  %s439_s4 = sshll.u32 %s624_s12, 4  ;;  %s440_s4 = int_to_ptr.vmem [resolvable:$true] %s439_s4 }
  0x1a   :  { %488 = vmatpush3.bf16.msra.mxu1 %v555_v11  ;;  %v474_v0 = vld [vmem:[%s727_s6] ss:$0 sm:$0xff]  ;;  %s594_s13 = scalar_lea.vmem %s440_s4, 256  ;;  %p599_p6 = scmp.lt.s32.totalorder %s440_s4, %s440_s4 }
  0x1b   :  { %489 = vmatprep.subr.bf16.mxu1 %v556_v12  ;;  %p595_p5 = scmp.ne.s32.totalorder %s440_s4, %s594_s13  ;;  %p600_p7 = scmp.lt.s32.totalorder %s594_s13, %s594_s13 }
  0x1c   :  { %517 = vmatpush3.bf16.msra.mxu0 %v567_v24 }
  0x1d   :  { %518 = vmatprep.subr.bf16.mxu0 %v622_v23  ;;  %p601_p8 = por %p600_p7, %p599_p6 }
  0x1e   :  { %490 = vmatpush3.bf16.msra.mxu1 %v557_v13 }
  0x1f   :  { %491 = vmatprep.subr.bf16.mxu1 %v558_v14  ;;  %p602_p9 = pnand %p601_p8, %p595_p5 }
  0x20   :  { %519 = vmatpush3.bf16.msra.mxu0 %v568_v25 }
  0x21   :  { %520 = vmatprep.subr.bf16.mxu0 %v622_v23 }
  0x22   :  { %492 = vmatpush3.bf16.msra.mxu1 %v559_v15 }
  0x23   :  { %493 = vmatprep.subr.bf16.mxu1 %v560_v16 }
  0x24   :  { %521 = vmatpush3.bf16.msra.mxu0 %v569_v26 }
  0x25   :  { %522 = vmatprep.subr.bf16.mxu0 %v622_v23 }
  0x26   :  { %494 = vmatpush3.bf16.msra.mxu1 %v561_v17 }
  0x27   :  { %495 = vmatprep.subr.bf16.mxu1 %v562_v18 }
  0x28   :  { %523 = vmatpush3.bf16.msra.mxu0 %v570_v48 }
  0x29   :  { %524 = vmatprep.subr.bf16.mxu0 %v622_v23 }
  0x2a   :  { %496 = vmatpush3.bf16.msra.mxu1 %v563_v19 }
  0x2b   :  { %497 = vmatprep.subr.bf16.mxu1 %v564_v20 }
  0x2c   :  { %525 = vmatpush3.bf16.msra.mxu0 %v571_v49 }
  0x2d   :  { %526 = vmatprep.subr.bf16.mxu0 %v622_v23 }
  0x2e   :  { %498 = vmatpush3.bf16.msra.mxu1 %v565_v21 }
  0x30   :  { %527 = vmatpush3.bf16.msra.mxu0 %v572_v50 }
  0x31   :  { %528 = vmatprep.subr.bf16.mxu0 %v622_v23 }
  0x34   :  { %529 = vmatpush3.bf16.msra.mxu0 %v573_v51 }
  0xd7   :  { %v123_v32 = vpop.f32.mrf.mxu0 }
  0xd8   :  { %v124_v39 = vadd.f32 %v123_v32, %v53_v34 }
  0xd9   :  { %v125_v35 = vpop.f32.mrf.mxu0 }
  0xda   :  { %v126_v37 = vadd.f32 %v125_v35, %v57_v33  ;;  %v132_v45 = vmax.f32 %v124_v39, 0.0 }
  0xdb   :  { %v127_v36 = vpop.f32.mrf.mxu0 }
  0xdc   :  { %v128_v38 = vadd.f32 %v127_v36, %v53_v34  ;;  %v133_v43 = vmax.f32 %v126_v37, 0.0 }
  0xdd   :  { %v129_v40 = vpop.f32.mrf.mxu0 }
  0xde   :  { %v130_v41 = vadd.f32 %v129_v40, %v57_v33  ;;  %v134_v42 = vmax.f32 %v128_v38, 0.0 }
  0xe0   :  { %v135_v44 = vmax.f32 %v130_v41, 0.0  ;;  %v136_v47 = vpack.c.bf16 %v134_v42, %v132_v45 }
  0xe2   :  { %v137_v46 = vpack.c.bf16 %v135_v44, %v133_v43 }
  0xe4   :  { %305 = vmatprep.mubr.bf16.mxu1 %v137_v46 }
  0xe5   :  { %306 = vmatmul.mubr.bf16.vlgmr.msra.gmra.mxu1 %v136_v47 }
 0x1a5   :  { %v499_v52 = vpop.f32.mrf.mxu1 }
 0x1a7   :  { %v500_v53 = vpop.f32.mrf.mxu1 }
 0x1a8   :  { %v501_v54 = vadd.f32 %v500_v53, %v499_v52 }
 0x1a9   :  { %v502_v56 = vpop.f32.mrf.mxu1 }
 0x1aa   :  { %v308_v58 = vadd.f32 %v501_v54, %v457_v55 }
 0x1ab   :  { %v503_v57 = vpop.f32.mrf.mxu1 }
 0x1ac   :  { %v504_v59 = vadd.f32 %v503_v57, %v502_v56  ;;  %v314_v61 = vmax.f32 %v308_v58, 0.0 }
 0x1ae   :  { %v311_v60 = vadd.f32 %v504_v59, %v457_v55 }
 0x1b0   :  { %v315_v62 = vmax.f32 %v311_v60, 0.0 }
 0x1b2   :  { %v316_v63 = vpack.c.bf16 %v315_v62, %v314_v61 }
 0x1b4   :  { %531 = vmatmul.mubr.bf16.vlgmr.msra.gmra.mxu0 %v316_v63 }
 0x274   :  { %v422_v1 = vpop.f32.mrf.mxu0 }
 0x275   :  { %v423_v2 = vadd.f32 %v474_v0, %v422_v1 }
 0x276   :  { %v532_v3 = vpop.f32.mrf.mxu0 }
 0x277   :  { %v429_v4 = vmax.f32 %v423_v2, 0.0 }
 0x278   :  { %v425_v5 = vpop.f32.mrf.mxu0 }
 0x279   :  { %432 = vst.msk [vmem:[#allocation5] sm:$0xff] %vm431_vm2, %v429_v4  ;;  %v426_v6 = vadd.f32 %v474_v0, %v425_v5 }
 0x27a   :  { %v533_v7 = vpop.f32.mrf.mxu0 }
 0x27b   :  { %v430_v8 = vmax.f32 %v426_v6, 0.0 }
 0x27d   :  { %433 = vst.msk [vmem:[#allocation5 + $0x8] sm:$0xff] %vm431_vm2, %v430_v8 }
 0x27e   :  { %605 = shalt.err (!%p602_p9)
}
 0x27f   :  { %s625_s6 = smov 128   ;;  %s626_s14 = smov 8  }
 0x280   :  { %445 = dma.vmem_to_hbm [thread:$0]  %s440_s4, 256, %s728_s7, [#allocation4], %s625_s6, %s625_s6, %s626_s14  }
 0x281   :  { %616 = dma.done.wait [#allocation4], 256  }
 0x282   :  { %617 = vsyncadd [#allocation4], 4294967040 }
 0x283   :  { %449 = vsyncpa [#allocation3], 1 }
 0x284   :  { %450 = vsyncpa [#allocation4], 1 }

</bundles_post_ra>
